<compile_context>
chip_gen: v6e
topology: v6e:2x2x1
jax: 0.10.0
libtpu: 0.0.40
codegen_flags: <defaults>
</compile_context>

<pallas_src>
import functools

import jax
import jax.numpy as jnp
import numpy as np
from jax.experimental import pallas as pl
from jax.experimental.pallas import tpu as pltpu

LANES = 128      # lane width of the padded output slab
N_MID = 3        # fused hidden layers after the first fused layer


# ---------------------------------------------------------------------------
# Kernel
# ---------------------------------------------------------------------------
def nn_model_fused_kernel(obs_dim, act_dim, hid_p,
                          obs_ref, act_ref, w1_ref, wmid_ref, whead_ref,
                          bias_ref, out_ref):
    f32, bf16 = jnp.float32, jnp.bfloat16

    obs = obs_ref[...]                               # (tb, obs_dim) f32
    action = act_ref[...]                            # (tb, act_dim) f32
    tb = obs.shape[0]
    fused = w1_ref.shape[1]

    # fused layer 1: split matmul replaces wrapper-side concat+pad of [obs|action]
    w1_obs = w1_ref[pl.ds(0, obs_dim), :]            # (obs_dim, fused) bf16
    w1_act = w1_ref[pl.ds(obs_dim, act_dim), :]      # (act_dim, fused) bf16
    h = (jnp.dot(obs.astype(bf16), w1_obs, preferred_element_type=f32)
         + jnp.dot(action.astype(bf16), w1_act, preferred_element_type=f32)
         + bias_ref[0:1, :fused])

    # lane mask computed once: swish on trunk_p lanes, relu on trunk_r lanes
    pmask = jax.lax.broadcasted_iota(jnp.int32, (tb, fused), 1) < hid_p

    def act_fn(z):                                   # 1 select + 1 mul (f32)
        return z * jnp.where(pmask, jax.nn.sigmoid(z), (z > 0.0).astype(f32))

    h = act_fn(h)

    # fused middle layers: block-diagonal (hp+hr, hp+hr) bf16 weights.
    # trunk_r is one layer shallower -> its third block is the identity and
    # re-applying relu to already non-negative r-lanes is a no-op.
    for l in range(N_MID):                           # static unroll (3 iters)
        h = (jnp.dot(h.astype(bf16), wmid_ref[l], preferred_element_type=f32)
             + bias_ref[l + 1:l + 2, :fused])
        h = act_fn(h)

    # fused heads padded to a lane-dense 128-wide slab:
    #   lanes [0:obs_dim] = mean, lane obs_dim = pre-tanh reward, rest = 0
    y = (jnp.dot(h.astype(bf16), whead_ref[...], preferred_element_type=f32)
         + bias_ref[N_MID + 1:N_MID + 2, :])

    lane = jax.lax.broadcasted_iota(jnp.int32, y.shape, 1)
    obs_pad = jnp.concatenate(
        [obs, jnp.zeros((tb, LANES - obs_dim), f32)], axis=1)
    # single lane-dense unmasked store: next_obs lanes get the residual add,
    # the reward lane gets tanh, padding lanes stay 0.
    out_ref[...] = jnp.where(lane == obs_dim, jnp.tanh(y), y + obs_pad)


# ---------------------------------------------------------------------------
# One-time host-side parameter packing (18 tensors -> 4 arrays)
# ---------------------------------------------------------------------------
def pack_params(trunk_p, trunk_r, obs_dim, act_dim):
    tp = [(np.asarray(w, np.float32), np.asarray(b, np.float32)) for w, b in trunk_p]
    tr = [(np.asarray(w, np.float32), np.asarray(b, np.float32)) for w, b in trunk_r]
    (wp0, bp0), (wp1, bp1), (wp2, bp2), (wp3, bp3), (wp4, bp4) = tp
    (wr0, br0), (wr1, br1), (wr2, br2), (wr3, br3) = tr
    hp, hr = wp0.shape[1], wr0.shape[1]
    in_dim = obs_dim + act_dim
    fused = hp + hr
    assert fused <= LANES and obs_dim + 1 <= LANES

    # layer 1: (in_dim, hp+hr); rows [0:obs_dim] multiply obs, rest multiply action
    w1 = np.zeros((in_dim, fused), np.float32)
    w1[:, :hp] = wp0
    w1[:, hp:] = wr0

    def blkdiag(wp, wr):
        w = np.zeros((fused, fused), np.float32)
        w[:hp, :hp] = wp
        w[hp:, hp:] = wr
        return w

    wmid = np.stack([blkdiag(wp1, wr1),
                     blkdiag(wp2, wr2),
                     blkdiag(wp3, np.eye(hr, dtype=np.float32))])   # (3, fused, fused)

    # heads padded to a lane-dense 128-wide output
    whead = np.zeros((fused, LANES), np.float32)
    whead[:hp, :obs_dim] = wp4
    whead[hp:, obs_dim:obs_dim + 1] = wr3

    # all biases merged into one (N_MID+2, 128) f32 slab
    biases = np.zeros((N_MID + 2, LANES), np.float32)
    biases[0, :fused] = np.concatenate([bp0.ravel(), br0.ravel()])
    biases[1, :fused] = np.concatenate([bp1.ravel(), br1.ravel()])
    biases[2, :fused] = np.concatenate([bp2.ravel(), br2.ravel()])
    biases[3, :hp] = bp3.ravel()                      # identity r-block: zero bias
    biases[4, :obs_dim] = bp4.ravel()
    biases[4, obs_dim] = br3.ravel()[0]

    return (jnp.asarray(w1, jnp.bfloat16),
            jnp.asarray(wmid, jnp.bfloat16),
            jnp.asarray(whead, jnp.bfloat16),
            jnp.asarray(biases, jnp.float32))


# ---------------------------------------------------------------------------
# Batch tiling: multiple-of-8 tile, <= ~2048 rows, >=2 grid steps once the
# batch is non-tiny (v7x has 2 TCs; "parallel" shards grid steps across them).
# ---------------------------------------------------------------------------
def _round_up(x, m):
    return ((x + m - 1) // m) * m


def _batch_tiling(B):
    b8 = _round_up(max(B, 1), 8)
    if b8 <= 256:
        nsteps = 1                                   # splitting tiny batches is pure overhead
    else:
        nsteps = max(2, -(-b8 // 2048))              # >=2 steps, tile <= ~2048 rows
    tb = _round_up(-(-b8 // nsteps), 8)
    return tb, tb * nsteps                           # (tile, padded batch)


# ---------------------------------------------------------------------------
# Wrapper (hot path: no parameter packing, no concat/pad of the inputs)
# ---------------------------------------------------------------------------
@functools.partial(jax.jit, static_argnames=("hid_p",))
def nn_model_forward(obs, action, w1, wmid, whead, biases, *, hid_p):
    B, obs_dim = obs.shape
    act_dim = action.shape[1]
    in_dim = obs_dim + act_dim
    fused = w1.shape[1]
    assert w1.shape[0] == in_dim

    tb, Bp = _batch_tiling(B)
    if Bp != B:                                      # only pads when needed
        obs_k = jnp.pad(obs, ((0, Bp - B), (0, 0)))
        act_k = jnp.pad(action, ((0, Bp - B), (0, 0)))
    else:
        obs_k, act_k = obs, action
    grid = (Bp // tb,)

    flops = 2 * Bp * (in_dim * fused + N_MID * fused * fused + fused * LANES)
    transcendentals = Bp * ((N_MID + 1) * fused + LANES)
    bytes_accessed = (4 * Bp * (obs_dim + act_dim + LANES)
                      + 2 * (in_dim * fused + N_MID * fused * fused + fused * LANES)
                      + 4 * (N_MID + 2) * LANES)

    kernel = functools.partial(nn_model_fused_kernel, obs_dim, act_dim, hid_p)

    out_slab = pl.pallas_call(
        kernel,
        out_shape=jax.ShapeDtypeStruct((Bp, LANES), jnp.float32),
        grid=grid,
        in_specs=[
            pl.BlockSpec((tb, obs_dim), lambda i: (i, 0)),                 # obs
            pl.BlockSpec((tb, act_dim), lambda i: (i, 0)),                 # action
            pl.BlockSpec((in_dim, fused), lambda i: (0, 0)),               # w1 (bf16)
            pl.BlockSpec((N_MID, fused, fused), lambda i: (0, 0, 0)),      # wmid (bf16)
            pl.BlockSpec((fused, LANES), lambda i: (0, 0)),                # whead (bf16)
            pl.BlockSpec((N_MID + 2, LANES), lambda i: (0, 0)),            # biases (f32)
        ],
        out_specs=pl.BlockSpec((tb, LANES), lambda i: (i, 0)),
        compiler_params=pltpu.CompilerParams(dimension_semantics=("parallel",)),
        cost_estimate=pl.CostEstimate(flops=flops,
                                      transcendentals=transcendentals,
                                      bytes_accessed=bytes_accessed),
    )(obs_k, act_k, w1, wmid, whead, biases)

    reward_hat = out_slab[:B, obs_dim:obs_dim + 1]
    next_obs = out_slab[:B, :obs_dim]
    return reward_hat, next_obs, None                # kind == 'D' => var is None


# ---------------------------------------------------------------------------
# Params + pure-JAX references
# ---------------------------------------------------------------------------
def init_params(key, obs_dim, act_dim, hidden_p, hidden_r):
    """Orthogonal weights, zero biases (matches weight_init). Stored (in, out)."""
    ortho = jax.nn.initializers.orthogonal()

    def linear(k, d_in, d_out):
        w = ortho(k, (d_in, d_out), jnp.float32)     # y = x @ W + b
        b = jnp.zeros((1, d_out), jnp.float32)
        return w, b

    keys = jax.random.split(key, 9)
    in_dim = obs_dim + act_dim
    p_dims = [(in_dim, hidden_p), (hidden_p, hidden_p), (hidden_p, hidden_p),
              (hidden_p, hidden_p), (hidden_p, obs_dim)]
    r_dims = [(in_dim, hidden_r), (hidden_r, hidden_r),
              (hidden_r, hidden_r), (hidden_r, 1)]
    trunk_p = [linear(keys[i], *d) for i, d in enumerate(p_dims)]
    trunk_r = [linear(keys[5 + i], *d) for i, d in enumerate(r_dims)]
    return trunk_p, trunk_r


def reference_forward(obs, action, trunk_p, trunk_r):
    """f32 reference matching the PyTorch module semantics."""
    xa = jnp.concatenate([obs, action], axis=1)
    h = xa
    for i, (w, b) in enumerate(trunk_p):
        h = h @ w + b
        if i < len(trunk_p) - 1:
            h = h * jax.nn.sigmoid(h)                # Swish
    mean = h
    r = xa
    for i, (w, b) in enumerate(trunk_r):
        r = r @ w + b
        if i < len(trunk_r) - 1:
            r = jnp.maximum(r, 0.0)                  # ReLU
    return jnp.tanh(r), obs + mean, None


def reference_forward_packed(obs, action, w1, wmid, whead, biases, obs_dim, hid_p):
    """Pure-JAX emulation of exactly what the kernel computes (bf16 operands)."""
    bf16, f32 = jnp.bfloat16, jnp.float32
    fused = w1.shape[1]
    xa = jnp.concatenate([obs, action], axis=1)
    h = jnp.dot(xa.astype(bf16), w1, preferred_element_type=f32) + biases[0:1, :fused]
    col = jnp.arange(fused)[None, :]

    def act_fn(z):
        return z * jnp.where(col < hid_p, jax.nn.sigmoid(z), (z > 0.0).astype(f32))

    h = act_fn(h)
    for l in range(N_MID):
        h = (jnp.dot(h.astype(bf16), wmid[l], preferred_element_type=f32)
             + biases[l + 1:l + 2, :fused])
        h = act_fn(h)
    y = (jnp.dot(h.astype(bf16), whead, preferred_element_type=f32)
         + biases[N_MID + 1:N_MID + 2, :])
    return jnp.tanh(y[:, obs_dim:obs_dim + 1]), obs + y[:, :obs_dim]


# ---------------------------------------------------------------------------
if __name__ == "__main__":
    # small shapes consistent with the module: obs_dim=16, act_dim=8, hidden=32, batch=8
    B, OBS_DIM, ACT_DIM, HID = 8, 16, 8, 32

    key = jax.random.PRNGKey(0)
    k_obs, k_act, k_params = jax.random.split(key, 3)
    obs = jax.random.normal(k_obs, (B, OBS_DIM), jnp.float32)
    action = jax.random.normal(k_act, (B, ACT_DIM), jnp.float32)

    trunk_p, trunk_r = init_params(k_params, OBS_DIM, ACT_DIM, HID, HID)

    # one-time packing, hoisted out of the per-call path
    w1, wmid, whead, biases = pack_params(trunk_p, trunk_r, OBS_DIM, ACT_DIM)

    reward_hat, next_obs, var = nn_model_forward(obs, action, w1, wmid, whead,
                                                 biases, hid_p=HID)
    jax.block_until_ready((reward_hat, next_obs))

    # 1) tight check vs. a pure-JAX emulation of the kernel's exact math
    pk_reward, pk_next_obs = reference_forward_packed(obs, action, w1, wmid, whead,
                                                      biases, OBS_DIM, HID)
    np.testing.assert_allclose(np.asarray(reward_hat), np.asarray(pk_reward),
                               rtol=2e-3, atol=2e-3)
    np.testing.assert_allclose(np.asarray(next_obs), np.asarray(pk_next_obs),
                               rtol=2e-3, atol=2e-3)

    # 2) loose check vs. the f32 module semantics (bf16 MXU operands trade a
    #    ~1e-2-level deviation for native MXU throughput, per the perf review)
    ref_reward, ref_next_obs, _ = reference_forward(obs, action, trunk_p, trunk_r)
    np.testing.assert_allclose(np.asarray(reward_hat), np.asarray(ref_reward),
                               rtol=5e-2, atol=5e-2)
    np.testing.assert_allclose(np.asarray(next_obs), np.asarray(ref_next_obs),
                               rtol=5e-2, atol=5e-2)

    assert var is None
    assert reward_hat.shape == (B, 1) and next_obs.shape == (B, OBS_DIM)
    print("KERNEL_OK")
</pallas_src>

<mosaic_0001>
module attributes {stable_mosaic.version = 11 : i64} {
  func.func @nn_model_fused_kernel(%arg0: i32, %arg1: memref<8x16xf32, #tpu.memory_space<vmem>>, %arg2: memref<8x8xf32, #tpu.memory_space<vmem>>, %arg3: memref<24x64xbf16, #tpu.memory_space<vmem>>, %arg4: memref<3x64x64xbf16, #tpu.memory_space<vmem>>, %arg5: memref<64x128xbf16, #tpu.memory_space<vmem>>, %arg6: memref<5x128xf32, #tpu.memory_space<vmem>>, %arg7: memref<8x128xf32, #tpu.memory_space<vmem>>) attributes {dimension_semantics = [#tpu.dimension_semantics<parallel>], iteration_bounds = array<i64: 1>, scalar_prefetch = 0 : i64, scratch_operands = 0 : i64, tpu.core_type = #tpu.core_type<tc>, window_params = [{transform_indices = @transform_0, window_bounds = array<i64: 8, 16>}, {transform_indices = @transform_1, window_bounds = array<i64: 8, 8>}, {pipeline_mode = #tpu.pipeline_mode<synchronous>, transform_indices = @transform_2, window_bounds = array<i64: 24, 64>}, {pipeline_mode = #tpu.pipeline_mode<synchronous>, transform_indices = @transform_3, window_bounds = array<i64: 3, 64, 64>}, {pipeline_mode = #tpu.pipeline_mode<synchronous>, transform_indices = @transform_4, window_bounds = array<i64: 64, 128>}, {pipeline_mode = #tpu.pipeline_mode<synchronous>, transform_indices = @transform_5, window_bounds = array<i64: 5, 128>}, {transform_indices = @transform_6, window_bounds = array<i64: 8, 128>}]} {
    %c0 = arith.constant 0 : index
    %c0_0 = arith.constant 0 : index
    %0 = vector.load %arg1[%c0, %c0_0] : memref<8x16xf32, #tpu.memory_space<vmem>>, vector<8x16xf32>
    %c0_1 = arith.constant 0 : index
    %c0_2 = arith.constant 0 : index
    %1 = vector.load %arg2[%c0_1, %c0_2] : memref<8x8xf32, #tpu.memory_space<vmem>>, vector<8x8xf32>
    %c0_3 = arith.constant 0 : index
    %c0_4 = arith.constant 0 : index
    %2 = vector.load %arg3[%c0_3, %c0_4] : memref<24x64xbf16, #tpu.memory_space<vmem>>, vector<16x64xbf16>
    %c16 = arith.constant 16 : index
    %c0_5 = arith.constant 0 : index
    %3 = vector.load %arg3[%c16, %c0_5] : memref<24x64xbf16, #tpu.memory_space<vmem>>, vector<8x64xbf16>
    %4 = arith.truncf %0 : vector<8x16xf32> to vector<8x16xbf16>
    %cst = arith.constant dense<0.000000e+00> : vector<8x64xf32>
    %5 = tpu.matmul %4, %2, %cst {dimension_numbers = #tpu.dot_dimension_numbers<[1], [0], [0], [1], [0, 0, 1, 1], [], []>} : vector<8x16xbf16>, vector<16x64xbf16>, vector<8x64xf32> -> vector<8x64xf32>
    %6 = arith.truncf %1 : vector<8x8xf32> to vector<8x8xbf16>
    %cst_6 = arith.constant dense<0.000000e+00> : vector<8x64xf32>
    %7 = tpu.matmul %6, %3, %cst_6 {dimension_numbers = #tpu.dot_dimension_numbers<[1], [0], [0], [1], [0, 0, 1, 1], [], []>} : vector<8x8xbf16>, vector<8x64xbf16>, vector<8x64xf32> -> vector<8x64xf32>
    %8 = arith.addf %5, %7 : vector<8x64xf32>
    %c0_7 = arith.constant 0 : index
    %c0_8 = arith.constant 0 : index
    %9 = vector.load %arg6[%c0_7, %c0_8] : memref<5x128xf32, #tpu.memory_space<vmem>>, vector<1x64xf32>
    %10 = vector.broadcast %9 : vector<1x64xf32> to vector<8x64xf32>
    %11 = arith.addf %8, %10 : vector<8x64xf32>
    %12 = tpu.iota {dimensions = array<i32: 1>} : vector<8x64xi32>
    %c32_i32 = arith.constant 32 : i32
    %13 = vector.broadcast %c32_i32 : i32 to vector<8x64xi32>
    %14 = arith.cmpi slt, %12, %13 : vector<8x64xi32>
    %15 = arith.negf %11 : vector<8x64xf32>
    %16 = math.exp %15 : vector<8x64xf32>
    %cst_9 = arith.constant 1.000000e+00 : f32
    %17 = vector.broadcast %cst_9 : f32 to vector<8x64xf32>
    %18 = arith.addf %17, %16 : vector<8x64xf32>
    %19 = arith.divf %17, %18 : vector<8x64xf32>
    %cst_10 = arith.constant 0.000000e+00 : f32
    %20 = vector.broadcast %cst_10 : f32 to vector<8x64xf32>
    %21 = arith.cmpf ogt, %11, %20 : vector<8x64xf32>
    %22 = arith.extui %21 : vector<8x64xi1> to vector<8x64xi32>
    %23 = arith.sitofp %22 : vector<8x64xi32> to vector<8x64xf32>
    %24 = arith.select %14, %19, %23 : vector<8x64xi1>, vector<8x64xf32>
    %25 = arith.mulf %11, %24 : vector<8x64xf32>
    %26 = arith.truncf %25 : vector<8x64xf32> to vector<8x64xbf16>
    %c0_11 = arith.constant 0 : index
    %c0_12 = arith.constant 0 : index
    %c0_13 = arith.constant 0 : index
    %27 = vector.load %arg4[%c0_11, %c0_12, %c0_13] : memref<3x64x64xbf16, #tpu.memory_space<vmem>>, vector<1x64x64xbf16>
    %28 = vector.shape_cast %27 : vector<1x64x64xbf16> to vector<64x64xbf16>
    %cst_14 = arith.constant dense<0.000000e+00> : vector<8x64xf32>
    %29 = tpu.matmul %26, %28, %cst_14 {dimension_numbers = #tpu.dot_dimension_numbers<[1], [0], [0], [1], [0, 0, 1, 1], [], []>} : vector<8x64xbf16>, vector<64x64xbf16>, vector<8x64xf32> -> vector<8x64xf32>
    %c1 = arith.constant 1 : index
    %c0_15 = arith.constant 0 : index
    %30 = vector.load %arg6[%c1, %c0_15] : memref<5x128xf32, #tpu.memory_space<vmem>>, vector<1x64xf32>
    %31 = vector.broadcast %30 : vector<1x64xf32> to vector<8x64xf32>
    %32 = arith.addf %29, %31 : vector<8x64xf32>
    %33 = arith.negf %32 : vector<8x64xf32>
    %34 = math.exp %33 : vector<8x64xf32>
    %cst_16 = arith.constant 1.000000e+00 : f32
    %35 = vector.broadcast %cst_16 : f32 to vector<8x64xf32>
    %36 = arith.addf %35, %34 : vector<8x64xf32>
    %37 = arith.divf %35, %36 : vector<8x64xf32>
    %cst_17 = arith.constant 0.000000e+00 : f32
    %38 = vector.broadcast %cst_17 : f32 to vector<8x64xf32>
    %39 = arith.cmpf ogt, %32, %38 : vector<8x64xf32>
    %40 = arith.extui %39 : vector<8x64xi1> to vector<8x64xi32>
    %41 = arith.sitofp %40 : vector<8x64xi32> to vector<8x64xf32>
    %42 = arith.select %14, %37, %41 : vector<8x64xi1>, vector<8x64xf32>
    %43 = arith.mulf %32, %42 : vector<8x64xf32>
    %44 = arith.truncf %43 : vector<8x64xf32> to vector<8x64xbf16>
    %c1_18 = arith.constant 1 : index
    %c0_19 = arith.constant 0 : index
    %c0_20 = arith.constant 0 : index
    %45 = vector.load %arg4[%c1_18, %c0_19, %c0_20] : memref<3x64x64xbf16, #tpu.memory_space<vmem>>, vector<1x64x64xbf16>
    %46 = vector.shape_cast %45 : vector<1x64x64xbf16> to vector<64x64xbf16>
    %cst_21 = arith.constant dense<0.000000e+00> : vector<8x64xf32>
    %47 = tpu.matmul %44, %46, %cst_21 {dimension_numbers = #tpu.dot_dimension_numbers<[1], [0], [0], [1], [0, 0, 1, 1], [], []>} : vector<8x64xbf16>, vector<64x64xbf16>, vector<8x64xf32> -> vector<8x64xf32>
    %c2 = arith.constant 2 : index
    %c0_22 = arith.constant 0 : index
    %48 = vector.load %arg6[%c2, %c0_22] : memref<5x128xf32, #tpu.memory_space<vmem>>, vector<1x64xf32>
    %49 = vector.broadcast %48 : vector<1x64xf32> to vector<8x64xf32>
    %50 = arith.addf %47, %49 : vector<8x64xf32>
    %51 = arith.negf %50 : vector<8x64xf32>
    %52 = math.exp %51 : vector<8x64xf32>
    %cst_23 = arith.constant 1.000000e+00 : f32
    %53 = vector.broadcast %cst_23 : f32 to vector<8x64xf32>
    %54 = arith.addf %53, %52 : vector<8x64xf32>
    %55 = arith.divf %53, %54 : vector<8x64xf32>
    %cst_24 = arith.constant 0.000000e+00 : f32
    %56 = vector.broadcast %cst_24 : f32 to vector<8x64xf32>
    %57 = arith.cmpf ogt, %50, %56 : vector<8x64xf32>
    %58 = arith.extui %57 : vector<8x64xi1> to vector<8x64xi32>
    %59 = arith.sitofp %58 : vector<8x64xi32> to vector<8x64xf32>
    %60 = arith.select %14, %55, %59 : vector<8x64xi1>, vector<8x64xf32>
    %61 = arith.mulf %50, %60 : vector<8x64xf32>
    %62 = arith.truncf %61 : vector<8x64xf32> to vector<8x64xbf16>
    %c2_25 = arith.constant 2 : index
    %c0_26 = arith.constant 0 : index
    %c0_27 = arith.constant 0 : index
    %63 = vector.load %arg4[%c2_25, %c0_26, %c0_27] : memref<3x64x64xbf16, #tpu.memory_space<vmem>>, vector<1x64x64xbf16>
    %64 = vector.shape_cast %63 : vector<1x64x64xbf16> to vector<64x64xbf16>
    %cst_28 = arith.constant dense<0.000000e+00> : vector<8x64xf32>
    %65 = tpu.matmul %62, %64, %cst_28 {dimension_numbers = #tpu.dot_dimension_numbers<[1], [0], [0], [1], [0, 0, 1, 1], [], []>} : vector<8x64xbf16>, vector<64x64xbf16>, vector<8x64xf32> -> vector<8x64xf32>
    %c3 = arith.constant 3 : index
    %c0_29 = arith.constant 0 : index
    %66 = vector.load %arg6[%c3, %c0_29] : memref<5x128xf32, #tpu.memory_space<vmem>>, vector<1x64xf32>
    %67 = vector.broadcast %66 : vector<1x64xf32> to vector<8x64xf32>
    %68 = arith.addf %65, %67 : vector<8x64xf32>
    %69 = arith.negf %68 : vector<8x64xf32>
    %70 = math.exp %69 : vector<8x64xf32>
    %cst_30 = arith.constant 1.000000e+00 : f32
    %71 = vector.broadcast %cst_30 : f32 to vector<8x64xf32>
    %72 = arith.addf %71, %70 : vector<8x64xf32>
    %73 = arith.divf %71, %72 : vector<8x64xf32>
    %cst_31 = arith.constant 0.000000e+00 : f32
    %74 = vector.broadcast %cst_31 : f32 to vector<8x64xf32>
    %75 = arith.cmpf ogt, %68, %74 : vector<8x64xf32>
    %76 = arith.extui %75 : vector<8x64xi1> to vector<8x64xi32>
    %77 = arith.sitofp %76 : vector<8x64xi32> to vector<8x64xf32>
    %78 = arith.select %14, %73, %77 : vector<8x64xi1>, vector<8x64xf32>
    %79 = arith.mulf %68, %78 : vector<8x64xf32>
    %80 = arith.truncf %79 : vector<8x64xf32> to vector<8x64xbf16>
    %c0_32 = arith.constant 0 : index
    %c0_33 = arith.constant 0 : index
    %81 = vector.load %arg5[%c0_32, %c0_33] : memref<64x128xbf16, #tpu.memory_space<vmem>>, vector<64x128xbf16>
    %cst_34 = arith.constant dense<0.000000e+00> : vector<8x128xf32>
    %82 = tpu.matmul %80, %81, %cst_34 {dimension_numbers = #tpu.dot_dimension_numbers<[1], [0], [0], [1], [0, 0, 1, 1], [], []>} : vector<8x64xbf16>, vector<64x128xbf16>, vector<8x128xf32> -> vector<8x128xf32>
    %c4 = arith.constant 4 : index
    %c0_35 = arith.constant 0 : index
    %83 = vector.load %arg6[%c4, %c0_35] : memref<5x128xf32, #tpu.memory_space<vmem>>, vector<1x128xf32>
    %84 = vector.broadcast %83 : vector<1x128xf32> to vector<8x128xf32>
    %85 = arith.addf %82, %84 : vector<8x128xf32>
    %86 = tpu.iota {dimensions = array<i32: 1>} : vector<8x128xi32>
    %cst_36 = arith.constant 0.000000e+00 : f32
    %87 = vector.broadcast %cst_36 : f32 to vector<8x112xf32>
    %88 = tpu.concatenate %0, %87 in 1 : vector<8x16xf32>, vector<8x112xf32> -> vector<8x128xf32>
    %c16_i32 = arith.constant 16 : i32
    %89 = vector.broadcast %c16_i32 : i32 to vector<8x128xi32>
    %90 = arith.cmpi eq, %86, %89 : vector<8x128xi32>
    %91 = math.tanh %85 : vector<8x128xf32>
    %92 = arith.addf %85, %88 : vector<8x128xf32>
    %93 = arith.select %90, %91, %92 : vector<8x128xi1>, vector<8x128xf32>
    %c0_37 = arith.constant 0 : index
    %c0_38 = arith.constant 0 : index
    %94 = vector.load %arg7[%c0_37, %c0_38] : memref<8x128xf32, #tpu.memory_space<vmem>>, vector<8x128xf32>
    tpu.vector_store %arg7[%c0_37, %c0_38], %93 {strides = array<i32>} : memref<8x128xf32, #tpu.memory_space<vmem>>, vector<8x128xf32>,
    return
  }
  func.func @transform_0(%arg0: i32) -> (i32, i32) {
    %c0_i32 = arith.constant 0 : i32
    %c0_i32_0 = arith.constant 0 : i32
    return %arg0, %c0_i32 : i32, i32
  }
  func.func @transform_1(%arg0: i32) -> (i32, i32) {
    %c0_i32 = arith.constant 0 : i32
    %c0_i32_0 = arith.constant 0 : i32
    return %arg0, %c0_i32 : i32, i32
  }
  func.func @transform_2(%arg0: i32) -> (i32, i32) {
    %c0_i32 = arith.constant 0 : i32
    %c0_i32_0 = arith.constant 0 : i32
    %c0_i32_1 = arith.constant 0 : i32
    return %c0_i32, %c0_i32_0 : i32, i32
  }
  func.func @transform_3(%arg0: i32) -> (i32, i32, i32) {
    %c0_i32 = arith.constant 0 : i32
    %c0_i32_0 = arith.constant 0 : i32
    %c0_i32_1 = arith.constant 0 : i32
    %c0_i32_2 = arith.constant 0 : i32
    return %c0_i32, %c0_i32_0, %c0_i32_1 : i32, i32, i32
  }
  func.func @transform_4(%arg0: i32) -> (i32, i32) {
    %c0_i32 = arith.constant 0 : i32
    %c0_i32_0 = arith.constant 0 : i32
    %c0_i32_1 = arith.constant 0 : i32
    return %c0_i32, %c0_i32_0 : i32, i32
  }
  func.func @transform_5(%arg0: i32) -> (i32, i32) {
    %c0_i32 = arith.constant 0 : i32
    %c0_i32_0 = arith.constant 0 : i32
    %c0_i32_1 = arith.constant 0 : i32
    return %c0_i32, %c0_i32_0 : i32, i32
  }
  func.func @transform_6(%arg0: i32) -> (i32, i32) {
    %c0_i32 = arith.constant 0 : i32
    %c0_i32_0 = arith.constant 0 : i32
    return %arg0, %c0_i32 : i32, i32
  }
}

</mosaic_0001>

<bundles_post_ra>
// kernel: nn_model_forward.1
= control target key start
LH: loop header
LB: loop body
LE: loop exit
PB: predicated region body
PF: predicated region fallthrough
CT: control target
= control target key end

     0   :  { %11 = vsyncpa [#allocation3], 0  ;;  %s999_s0 = inlined_call_operand.hbm [shape: f32[8,16], index: 0, kind: input, shape index: {}]   ;;  %s1000_s1 = inlined_call_operand.hbm [shape: f32[8,8], index: 1, kind: input, shape index: {}]   ;;  %s1001_s2 = inlined_call_operand.hbm [shape: bf16[24,64], index: 2, kind: input, shape index: {}]   ;;  %s1002_s3 = inlined_call_operand.hbm [shape: bf16[3,64,64], index: 3, kind: input, shape index: {}]   ;;  %s1003_s4 = inlined_call_operand.hbm [shape: bf16[64,128], index: 4, kind: input, shape index: {}]   ;;  %s1004_s5 = inlined_call_operand.vmem [shape: f32[5,128], index: 5, kind: input, shape index: {}]   ;;  %s1005_s6 = inlined_call_operand.vmem [shape: f32[8,128], index: 6, kind: output, shape index: {}]  }
   0x1   :  { %12 = vsyncpa [#allocation5], 0 }
   0x2   :  { %13 = vsyncpa [#allocation8], 0  ;;  %s856_s21 = smov [#allocation4]  }
   0x3   :  { %s30_s22 = sshll.u32 %s856_s21, 4  ;;  %s31_s22 = int_to_ptr.vmem [resolvable:$true] %s30_s22 }
   0x4   :  { %s758_s23 = scalar_lea.vmem %s31_s22, 128  ;;  %p763_p1 = scmp.lt.s32.totalorder %s31_s22, %s31_s22 }
   0x5   :  { %p759_p0 = scmp.ne.s32.totalorder %s31_s22, %s758_s23  ;;  %p764_p2 = scmp.lt.s32.totalorder %s758_s23, %s758_s23 }
   0x7   :  { %p765_p3 = por %p764_p2, %p763_p1 }
   0x9   :  { %p766_p4 = pnand %p765_p3, %p759_p0 }
   0xb   :  { %769 = shalt.err (!%p766_p4)
}
   0xc   :  { %33 = dma.hbm_to_vmem [thread:$0]  %s1000_s1, 128, %s31_s22, [#allocation5]  }
   0xd   :  { %s857_s26 = smov [#allocation7]   ;;  %s858_s28 = smov [#allocation2]  }
   0xe   :  { %s51_s27 = sshll.u32 %s857_s26, 4  ;;  %s20_s29 = sshll.u32 %s858_s28, 4  ;;  %s52_s27 = int_to_ptr.vmem [resolvable:$true] %s51_s27  ;;  %s21_s29 = int_to_ptr.vmem [resolvable:$true] %s20_s29 }
   0xf   :  { %s778_s30 = scalar_lea.vmem %s52_s27, 1536  ;;  %p783_p6 = scmp.lt.s32.totalorder %s52_s27, %s52_s27 }
  0x10   :  { %p779_p5 = scmp.ne.s32.totalorder %s52_s27, %s778_s30  ;;  %p784_p7 = scmp.lt.s32.totalorder %s778_s30, %s778_s30 }
  0x12   :  { %p785_p8 = por %p784_p7, %p783_p6 }
  0x14   :  { %p786_p9 = pnand %p785_p8, %p779_p5 }
  0x16   :  { %789 = shalt.err (!%p786_p9)
}
  0x17   :  { %s859_s7 = smov 64   ;;  %s860_s8 = smov 4  }
  0x18   :  { %57 = dma.hbm_to_vmem [thread:$0]  %s1002_s3, 1536, %s52_s27, [#allocation8], %s859_s7, %s859_s7, %s860_s8  }
  0x19   :  { %s798_s1 = scalar_lea.vmem %s21_s29, 128  ;;  %p803_p11 = scmp.lt.s32.totalorder %s21_s29, %s21_s29 }
  0x1a   :  { %p799_p10 = scmp.ne.s32.totalorder %s21_s29, %s798_s1  ;;  %p804_p12 = scmp.lt.s32.totalorder %s798_s1, %s798_s1 }
  0x1c   :  { %p805_p13 = por %p804_p12, %p803_p11 }
  0x1e   :  { %p806_p0 = pnand %p805_p13, %p799_p10 }
  0x20   :  { %809 = shalt.err (!%p806_p0)
}
  0x21   :  { %23 = dma.hbm_to_vmem [thread:$0]  %s999_s0, 128, %s21_s29, [#allocation3]  }
  0x22   :  { %s861_s13 = smov [#allocation6]   ;;  %s862_s15 = smov [#allocation9]  }
  0x23   :  { %s39_s14 = sshll.u32 %s861_s13, 4  ;;  %s63_s16 = sshll.u32 %s862_s15, 4  ;;  %s40_s14 = int_to_ptr.vmem [resolvable:$true] %s39_s14  ;;  %s64_s16 = int_to_ptr.vmem [resolvable:$true] %s63_s16 }
  0x24   :  { %s818_s17 = scalar_lea.vmem %s40_s14, 192  ;;  %p823_p2 = scmp.lt.s32.totalorder %s40_s14, %s40_s14 }
  0x25   :  { %p819_p1 = scmp.ne.s32.totalorder %s40_s14, %s818_s17  ;;  %p824_p3 = scmp.lt.s32.totalorder %s818_s17, %s818_s17 }
  0x27   :  { %p825_p4 = por %p824_p3, %p823_p2 }
  0x29   :  { %p826_p5 = pnand %p825_p4, %p819_p1 }
  0x2b   :  { %829 = shalt.err (!%p826_p5)
}
  0x2c   :  { %45 = dma.hbm_to_vmem [thread:$0]  %s1001_s2, 192, %s40_s14, [#allocation5], %s859_s7, %s859_s7, %s860_s8  }
  0x2d   :  { %s838_s0 = scalar_lea.vmem %s64_s16, 512  ;;  %p843_p7 = scmp.lt.s32.totalorder %s64_s16, %s64_s16 }
  0x2e   :  { %p839_p6 = scmp.ne.s32.totalorder %s64_s16, %s838_s0  ;;  %p844_p8 = scmp.lt.s32.totalorder %s838_s0, %s838_s0 }
  0x30   :  { %p845_p9 = por %p844_p8, %p843_p7 }
  0x32   :  { %p846_p10 = pnand %p845_p9, %p839_p6 }
  0x34   :  { %849 = shalt.err (!%p846_p10)
}
  0x35   :  { %69 = dma.hbm_to_vmem [thread:$0]  %s1003_s4, 512, %s64_s16, [#allocation8], %s859_s7, %s859_s7, %s860_s8  }
  0x36   :  { %850 = dma.done.wait [#allocation3], 128  }
  0x37   :  { %851 = vsyncadd [#allocation3], 4294967168 }
  0x38   :  { %852 = dma.done.wait [#allocation5], 320  }
  0x39   :  { %853 = vsyncadd [#allocation5], 4294966976 }
  0x3a   :  { %854 = dma.done.wait [#allocation8], 2048  }
  0x3b   :  { %855 = vsyncadd [#allocation8], 4294965248  ;;  %v863_v0 = vmov 0.0   ;;  %vm864_vm0 = vmmov 0   ;;  %vm99_vm1 = vcmask 1043456   ;;  %v715_v3 = vld [vmem:[#allocation6] sm:$0xff]   ;;  %v199_v26 = vlaneseq }
  0x3c   :  { %646 = vmatprep.subr.bf16.mxu0 %v863_v0  ;;  %652 = vmatprep.subr.bf16.mxu1 %v863_v0  ;;  %v92_v1 = vld [vmem:[#allocation6 + $0x8] sm:$0xf]  ;;  %v89_v4 = vld [vmem:[#allocation4] sm:$0xff]  ;;  %vm95_vm2 = vcmask 64512   ;;  %v930_v5 = vld [vmem:[#allocation2] sm:$0xff]  ;;  %vm149_vm3 = vcmask 130048  }
  0x3d   :  { %648 = vmatprep.mubr.msk.bf16.mxu0 %vm864_vm0, %v863_v0  ;;  %654 = vmatprep.mubr.msk.bf16.mxu1 %vm864_vm0, %v863_v0  ;;  %v101_v2 = vsel %vm99_vm1, %v92_v1, 0  ;;  %v94_v6 = vpack.c.bf16 %v89_v4, %v89_v4  ;;  %v93_v7 = vpack.c.bf16 %v930_v5, %v930_v5  ;;  %v716_v8 = vld [vmem:[#allocation7 + $0x18] sm:$0xff]   ;;  %v717_v9 = vld [vmem:[#allocation7 + $0x10] sm:$0xff]   ;;  %v718_v10 = vld [vmem:[#allocation7 + $0x8] sm:$0xff]   ;;  %v948_v27 = vand.u32 127, %v199_v26 }
  0x3e   :  { %647 = vmatpush3.bf16.msra.mxu0 %v101_v2  ;;  %653 = vmatpush3.bf16.msra.mxu1 %v715_v3  ;;  %v719_v11 = vld [vmem:[#allocation7] sm:$0xff]   ;;  %vm251_vm6 = vcmask 523264   ;;  %v720_v33 = vld [vmem:[#allocation7 + $0x38] sm:$0xff]   ;;  %v721_v34 = vld [vmem:[#allocation7 + $0x30] sm:$0xff]  }
  0x3f   :  { %658 = vmatprep.subr.bf16.mxu0 %v863_v0  ;;  %670 = vmatprep.subr.bf16.mxu1 %v863_v0  ;;  %v589_v14 = vld [vmem:[%s1004_s5] ss:$0 sm:$0xff]  ;;  %vm201_vm5 = vcmp.lt.s32.totalorder %v948_v27, 32  ;;  %v722_v35 = vld [vmem:[#allocation7 + $0x28] sm:$0xff]   ;;  %v592_v37 = vld [vmem:[%s1004_s5 + $0x1] ss:$0 sm:$0xff] }
  0x40   :  { %v723_v36 = vld [vmem:[#allocation7 + $0x20] sm:$0xff]   ;;  %v724_v51 = vld [vmem:[#allocation7 + $0x58] sm:$0xff]   ;;  %v725_v52 = vld [vmem:[#allocation7 + $0x50] sm:$0xff]   ;;  %vm574_vm10 = vcmp.eq.s32.totalorder %v948_v27, 16 }
  0x41   :  { %649 = vmatmul.mubr.msk.bf16.vlgmr.msra.gmra.mxu0 %vm95_vm2, %v94_v6  ;;  %655 = vmatmul.mubr.msk.bf16.vlgmr.msra.gmra.mxu1 %vm149_vm3, %v93_v7  ;;  %v726_v53 = vld [vmem:[#allocation7 + $0x48] sm:$0xff]   ;;  %v727_v54 = vld [vmem:[#allocation7 + $0x40] sm:$0xff]   ;;  %v728_v7 = vld [vmem:[#allocation9 + $0x18] sm:$0xff]  }
  0x42   :  { %666 = vmatprep.mubr.msk.bf16.mxu0 %vm864_vm0, %v863_v0  ;;  %678 = vmatprep.mubr.msk.bf16.mxu1 %vm864_vm0, %v863_v0  ;;  %v600_v55 = vld [vmem:[%s1004_s5 + $0x2] ss:$0 sm:$0xff] }
  0x43   :  { %659 = vmatpush3.bf16.msra.mxu0 %v716_v8  ;;  %671 = vmatpush3.bf16.msra.mxu1 %v720_v33  ;;  %v729_v8 = vld [vmem:[#allocation9 + $0x10] sm:$0xff]  }
  0x44   :  { %660 = vmatprep.subr.bf16.mxu0 %v863_v0  ;;  %672 = vmatprep.subr.bf16.mxu1 %v863_v0 }
  0x47   :  { %661 = vmatpush3.bf16.msra.mxu0 %v717_v9  ;;  %673 = vmatpush3.bf16.msra.mxu1 %v721_v34  ;;  %v730_v9 = vld [vmem:[#allocation9 + $0x8] sm:$0xff]  }
  0x48   :  { %662 = vmatprep.subr.bf16.mxu0 %v863_v0  ;;  %674 = vmatprep.subr.bf16.mxu1 %v863_v0 }
  0x4b   :  { %663 = vmatpush3.bf16.msra.mxu0 %v718_v10  ;;  %675 = vmatpush3.bf16.msra.mxu1 %v722_v35  ;;  %v731_v10 = vld [vmem:[#allocation9] sm:$0xff]  }
  0x4c   :  { %664 = vmatprep.subr.bf16.mxu0 %v863_v0  ;;  %676 = vmatprep.subr.bf16.mxu1 %v863_v0 }
  0x4f   :  { %665 = vmatpush3.bf16.msra.mxu0 %v719_v11  ;;  %677 = vmatpush3.bf16.msra.mxu1 %v723_v36  ;;  %v608_v11 = vld [vmem:[%s1004_s5 + $0x3] ss:$0 sm:$0xff] }
  0x50   :  { %682 = vmatprep.subr.bf16.mxu0 %v863_v0  ;;  %694 = vmatprep.subr.bf16.mxu1 %v863_v0 }
 0x101   :  { %v137_v12 = vpop.f32.mrf.mxu0  ;;  %v187_v13 = vpop.f32.mrf.mxu1 }
 0x102   :  { %v188_v15 = vadd.f32 %v187_v13, %v137_v12 }
 0x103   :  { %v650_v16 = vpop.f32.mrf.mxu0  ;;  %v656_v17 = vpop.f32.mrf.mxu1 }
 0x104   :  { %v198_v18 = vadd.f32 %v589_v14, %v188_v15 }
 0x105   :  { %v140_v19 = vpop.f32.mrf.mxu0  ;;  %v190_v20 = vpop.f32.mrf.mxu1 }
 0x106   :  { %v590_v21 = vmul.f32 -1.442695, %v198_v18  ;;  %vm208_vm4 = vcmp.gt.f32.partialorder %v198_v18, 0.0 }
 0x107   :  { %v651_v22 = vpop.f32.mrf.mxu0  ;;  %v657_v23 = vpop.f32.mrf.mxu1  ;;  %v591_v29 = vsel %vm208_vm4, 1.0, %v863_v0 }
 0x108   :  { %732 = vpow2.f32 %v590_v21 }
 0x115   :  { %v733_v24 = vpop.eup %732 }
 0x116   :  { %v205_v25 = vadd.f32 1.0, %v733_v24 }
 0x118   :  { %734 = vrcp.f32 %v205_v25  ;;  %v616_v25 = vld [vmem:[%s1004_s5 + $0x4] ss:$0 sm:$0xff] }
 0x125   :  { %v735_v28 = vpop.eup %734 }
 0x126   :  { %v211_v30 = vsel %vm201_vm5, %v735_v28, %v591_v29 }
 0x127   :  { %v212_v31 = vmul.f32 %v211_v30, %v198_v18 }
 0x129   :  { %v213_v32 = vpack.c.bf16 %v212_v31, %v212_v31 }
 0x12b   :  { %667 = vmatmul.mubr.msk.bf16.vlgmr.msra.gmra.mxu0 %vm251_vm6, %v213_v32 }
 0x12c   :  { %690 = vmatprep.mubr.msk.bf16.mxu0 %vm864_vm0, %v863_v0  ;;  %683 = vmatpush3.bf16.msra.mxu0 %v724_v51 }
 0x12d   :  { %684 = vmatprep.subr.bf16.mxu0 %v863_v0 }
 0x130   :  { %685 = vmatpush3.bf16.msra.mxu0 %v725_v52 }
 0x131   :  { %686 = vmatprep.subr.bf16.mxu0 %v863_v0 }
 0x134   :  { %687 = vmatpush3.bf16.msra.mxu0 %v726_v53 }
 0x135   :  { %688 = vmatprep.subr.bf16.mxu0 %v863_v0 }
 0x138   :  { %689 = vmatpush3.bf16.msra.mxu0 %v727_v54 }
 0x1eb   :  { %v289_v38 = vpop.f32.mrf.mxu0 }
 0x1ec   :  { %v290_v39 = vadd.f32 %v592_v37, %v289_v38 }
 0x1ed   :  { %v668_v40 = vpop.f32.mrf.mxu0 }
 0x1ee   :  { %v598_v41 = vmul.f32 -1.442695, %v290_v39  ;;  %vm301_vm7 = vcmp.gt.f32.partialorder %v290_v39, 0.0 }
 0x1ef   :  { %v292_v42 = vpop.f32.mrf.mxu0  ;;  %v599_v47 = vsel %vm301_vm7, 1.0, %v863_v0 }
 0x1f0   :  { %736 = vpow2.f32 %v598_v41 }
 0x1f1   :  { %v669_v43 = vpop.f32.mrf.mxu0 }
 0x1fd   :  { %v737_v44 = vpop.eup %736 }
 0x1fe   :  { %v298_v45 = vadd.f32 1.0, %v737_v44 }
 0x200   :  { %738 = vrcp.f32 %v298_v45 }
 0x20d   :  { %v739_v46 = vpop.eup %738 }
 0x20e   :  { %v304_v48 = vsel %vm201_vm5, %v739_v46, %v599_v47 }
 0x20f   :  { %v305_v49 = vmul.f32 %v304_v48, %v290_v39 }
 0x211   :  { %v306_v50 = vpack.c.bf16 %v305_v49, %v305_v49 }
 0x213   :  { %679 = vmatmul.mubr.msk.bf16.vlgmr.msra.gmra.mxu1 %vm251_vm6, %v306_v50 }
 0x214   :  { %702 = vmatprep.mubr.msk.bf16.mxu1 %vm864_vm0, %v863_v0  ;;  %695 = vmatpush3.bf16.msra.mxu1 %v728_v7 }
 0x215   :  { %696 = vmatprep.subr.bf16.mxu1 %v863_v0 }
 0x218   :  { %697 = vmatpush3.bf16.msra.mxu1 %v729_v8 }
 0x219   :  { %698 = vmatprep.subr.bf16.mxu1 %v863_v0 }
 0x21c   :  { %699 = vmatpush3.bf16.msra.mxu1 %v730_v9 }
 0x21d   :  { %700 = vmatprep.subr.bf16.mxu1 %v863_v0 }
 0x220   :  { %701 = vmatpush3.bf16.msra.mxu1 %v731_v10 }
 0x2d3   :  { %v382_v56 = vpop.f32.mrf.mxu1 }
 0x2d4   :  { %v383_v57 = vadd.f32 %v600_v55, %v382_v56 }
 0x2d5   :  { %v680_v58 = vpop.f32.mrf.mxu1 }
 0x2d6   :  { %v606_v59 = vmul.f32 -1.442695, %v383_v57  ;;  %vm394_vm8 = vcmp.gt.f32.partialorder %v383_v57, 0.0 }
 0x2d7   :  { %v385_v60 = vpop.f32.mrf.mxu1  ;;  %v607_v2 = vsel %vm394_vm8, 1.0, %v863_v0 }
 0x2d8   :  { %740 = vpow2.f32 %v606_v59 }
 0x2d9   :  { %v681_v61 = vpop.f32.mrf.mxu1 }
 0x2e5   :  { %v741_v62 = vpop.eup %740 }
 0x2e6   :  { %v391_v63 = vadd.f32 1.0, %v741_v62 }
 0x2e8   :  { %742 = vrcp.f32 %v391_v63 }
 0x2f5   :  { %v743_v1 = vpop.eup %742 }
 0x2f6   :  { %v397_v3 = vsel %vm201_vm5, %v743_v1, %v607_v2 }
 0x2f7   :  { %v398_v4 = vmul.f32 %v397_v3, %v383_v57 }
 0x2f9   :  { %v399_v6 = vpack.c.bf16 %v398_v4, %v398_v4 }
 0x2fb   :  { %691 = vmatmul.mubr.msk.bf16.vlgmr.msra.gmra.mxu0 %vm251_vm6, %v399_v6 }
 0x3bb   :  { %v475_v12 = vpop.f32.mrf.mxu0 }
 0x3bc   :  { %v476_v13 = vadd.f32 %v608_v11, %v475_v12 }
 0x3bd   :  { %v692_v14 = vpop.f32.mrf.mxu0 }
 0x3be   :  { %v614_v15 = vmul.f32 -1.442695, %v476_v13  ;;  %vm487_vm9 = vcmp.gt.f32.partialorder %v476_v13, 0.0 }
 0x3bf   :  { %v478_v16 = vpop.f32.mrf.mxu0  ;;  %v615_v21 = vsel %vm487_vm9, 1.0, %v863_v0  ;;  %v573_v0 = vsel %vm149_vm3, %v930_v5, 0.0 }
 0x3c0   :  { %744 = vpow2.f32 %v614_v15 }
 0x3c1   :  { %v693_v17 = vpop.f32.mrf.mxu0 }
 0x3cd   :  { %v745_v18 = vpop.eup %744 }
 0x3ce   :  { %v484_v19 = vadd.f32 1.0, %v745_v18 }
 0x3d0   :  { %746 = vrcp.f32 %v484_v19 }
 0x3dd   :  { %v747_v20 = vpop.eup %746 }
 0x3de   :  { %v490_v22 = vsel %vm201_vm5, %v747_v20, %v615_v21 }
 0x3df   :  { %v491_v23 = vmul.f32 %v490_v22, %v476_v13 }
 0x3e1   :  { %v492_v24 = vpack.c.bf16 %v491_v23, %v491_v23 }
 0x3e3   :  { %703 = vmatmul.mubr.msk.bf16.vlgmr.msra.gmra.mxu1 %vm251_vm6, %v492_v24 }
 0x4a3   :  { %v567_v26 = vpop.f32.mrf.mxu1 }
 0x4a4   :  { %v568_v28 = vadd.f32 %v616_v25, %v567_v26 }
 0x4a5   :  { %v704_v29 = vpop.f32.mrf.mxu1 }
 0x4a6   :  { %748 = vtanh.f32 %v568_v28  ;;  %v576_v32 = vadd.f32 %v573_v0, %v568_v28 }
 0x4a7   :  { %v570_v30 = vpop.f32.mrf.mxu1 }
 0x4a9   :  { %v705_v31 = vpop.f32.mrf.mxu1 }
 0x4b3   :  { %v749_v33 = vpop.eup %748 }
 0x4b4   :  { %v577_v34 = vsel %vm574_vm10, %v749_v33, %v576_v32 }
 0x4b5   :  { %578 = vst [vmem:[%s1005_s6] sm:$0xff] %v577_v34 }
 0x4b6   :  { %583 = vsyncpa [#allocation3], 1 }
 0x4b7   :  { %584 = vsyncpa [#allocation5], 1 }
 0x4b8   :  { %585 = vsyncpa [#allocation8], 1 }

</bundles_post_ra>
